<compile_context>
chip_gen: v7x
topology: tpu7x:2x2x1
jax: 0.10.0
libtpu: 0.0.40
codegen_flags: <defaults>
</compile_context>

<pallas_src>
import functools
import math

import jax
import jax.numpy as jnp
from jax.experimental import pallas as pl
from jax.experimental.pallas import tpu as pltpu

D_MODEL = 32
EPS = 1e-6
_LANES = 128
_MIN_SPLIT_PACKED_ROWS = 512   # below this, a single full-extent block is used


def _layernorm_kernel(x_ref, seg_ref, g_ref, b_ref, o_ref, *, eps):
    # x_ref / o_ref: (block_rows, 128) lane-dense; each 128-lane row packs 128//d
    #                logical rows of width d (consecutive in memory).
    # seg_ref:       (128, 128) constant, block-diagonal, entries 1/d (pre-scaled
    #                segment-mean matrix for the otherwise-idle MXU).
    # g_ref / b_ref: (1, 128) = gamma / beta tiled 128//d times along lanes.
    x = x_ref[...].astype(jnp.float32)
    seg = seg_ref[...]

    # Per-segment mean, already broadcast across that segment's lanes.  Mosaic's
    # default f32 matmul path is the accurate multi-pass one (checked against the
    # offset-data reference in __main__).
    # TODO(synk): an exact bf16 (0 / 1/d) seg RHS would cut MXU passes on v5e.
    mean = jnp.dot(x, seg, preferred_element_type=jnp.float32)
    c = x - mean
    # Biased variance (matches torch.nn.LayerNorm).  It is a sum of squares, so it
    # stays >= 0 even for garbage rows of a partial last block; rsqrt stays finite
    # there and the out-of-bounds rows' writes are masked by Pallas anyway.
    var = jnp.dot(c * c, seg, preferred_element_type=jnp.float32)
    inv = jax.lax.rsqrt(var + eps)

    scale = inv * g_ref[...].astype(jnp.float32)
    o_ref[...] = (c * scale + b_ref[...].astype(jnp.float32)).astype(o_ref.dtype)


def _round_up(x, m):
    return ((x + m - 1) // m) * m


@functools.partial(jax.jit, static_argnames=("block_rows",))
def layer_normalization(x, gamma, beta, *, block_rows=1024):
    """x: (..., d_model); gamma/beta: (d_model,). Returns same shape/dtype as x."""
    orig_shape = x.shape
    d = orig_shape[-1]
    assert _LANES % d == 0, "d_model must divide 128 for the lane-dense packing"
    # TODO(synk): a d_model that does not divide 128 needs an unpacked fallback path.
    pack = _LANES // d

    # Sublane tile of the I/O dtype: 8 (f32) / 16 (bf16) / 32 (int8 / fp8).
    sub = 8 * (4 // jnp.dtype(x.dtype).itemsize)
    assert block_rows % sub == 0

    rows = math.prod(orig_shape[:-1])
    x2 = x.reshape(rows, d)

    # Fast path: rows % pack == 0 (true for the shapes used here) -> no copies.
    # Otherwise fall back to a pad; padded zero rows give var=0 -> inv=1/sqrt(eps)
    # (finite) and are sliced off below.
    # TODO(synk): replace the pad fallback with an in-kernel masked tail so the
    # ragged case avoids the extra full-tensor copy.
    pad = (-rows) % pack
    if pad:
        x2 = jnp.pad(x2, ((0, pad), (0, 0)))
    packed_rows = (rows + pad) // pack
    x_packed = x2.reshape(packed_rows, _LANES)

    # Constant block-diagonal segment-mean matrix, built ONCE outside the kernel:
    # seg[i, j] = 1/d iff lanes i and j belong to the same d-wide logical row.
    lane = jnp.arange(_LANES, dtype=jnp.int32)
    seg = ((lane[:, None] // d) == (lane[None, :] // d)).astype(jnp.float32) * (1.0 / d)

    g_packed = jnp.tile(gamma.reshape(1, d).astype(jnp.float32), (1, pack))
    b_packed = jnp.tile(beta.reshape(1, d).astype(jnp.float32), (1, pack))

    if packed_rows <= _MIN_SPLIT_PACKED_ROWS:
        br = packed_rows           # single full-extent block; no (8,128) constraint
    else:
        # Always >= ~8 grid steps (>= 2x per core on v7x), capped by block_rows;
        # the last block may be partial, its writes are masked.
        br = max(sub, min(block_rows, _round_up(pl.cdiv(packed_rows, 8), sub)))
    grid = (pl.cdiv(packed_rows, br),)

    out = pl.pallas_call(
        functools.partial(_layernorm_kernel, eps=EPS),
        out_shape=jax.ShapeDtypeStruct((packed_rows, _LANES), x.dtype),
        grid_spec=pltpu.PrefetchScalarGridSpec(
            num_scalar_prefetch=0,
            grid=grid,
            in_specs=[
                pl.BlockSpec((br, _LANES), lambda i: (i, 0)),
                pl.BlockSpec((_LANES, _LANES), lambda i: (0, 0)),
                pl.BlockSpec((1, _LANES), lambda i: (0, 0)),
                pl.BlockSpec((1, _LANES), lambda i: (0, 0)),
            ],
            out_specs=pl.BlockSpec((br, _LANES), lambda i: (i, 0)),
        ),
        # TODO(synk): on v7x, if "parallel" does not shard the row axis across the
        # two TensorCores, switch to pltpu.CORE_PARALLEL / explicit core_map.
        compiler_params=pltpu.CompilerParams(
            dimension_semantics=("parallel",),
        ),
    )(x_packed, seg, g_packed, b_packed)

    out = out.reshape(packed_rows * pack, d)
    if pad:
        out = out[:rows]
    return out.reshape(orig_shape)


if __name__ == "__main__":
    key = jax.random.PRNGKey(0)
    batch, seq = 2, 8
    # Offset + scaled data exercises mean-subtraction accuracy of the MXU
    # segment-sum path (catches any low-precision matmul lowering).
    x = 2.0 * jax.random.normal(key, (batch, seq, D_MODEL), dtype=jnp.float32) + 10.0

    # nn.LayerNorm defaults: weight = 1, bias = 0
    gamma = jnp.ones((D_MODEL,), dtype=jnp.float32)
    beta = jnp.zeros((D_MODEL,), dtype=jnp.float32)

    y = layer_normalization(x, gamma, beta)
    jax.block_until_ready(y)

    # sanity check against pure-JAX reference (biased variance, eps inside sqrt)
    mean = jnp.mean(x, axis=-1, keepdims=True)
    var = jnp.mean((x - mean) ** 2, axis=-1, keepdims=True)
    ref = (x - mean) / jnp.sqrt(var + EPS) * gamma + beta
    assert jnp.allclose(y, ref, atol=1e-4, rtol=1e-4), float(jnp.max(jnp.abs(y - ref)))
    assert y.shape == x.shape and y.dtype == x.dtype

    print("KERNEL_OK")
</pallas_src>

<mosaic_0001>
module attributes {stable_mosaic.version = 11 : i64} {
  func.func @_layernorm_kernel(%arg0: i32, %arg1: memref<4x128xf32, #tpu.memory_space<vmem>>, %arg2: memref<128x128xf32, #tpu.memory_space<vmem>>, %arg3: memref<1x128xf32, #tpu.memory_space<vmem>>, %arg4: memref<1x128xf32, #tpu.memory_space<vmem>>, %arg5: memref<4x128xf32, #tpu.memory_space<vmem>>) attributes {dimension_semantics = [#tpu.dimension_semantics<parallel>], iteration_bounds = array<i64: 1>, scalar_prefetch = 0 : i64, scratch_operands = 0 : i64, tpu.core_type = #tpu.core_type<tc>, window_params = [{transform_indices = @transform_0, window_bounds = array<i64: 4, 128>}, {pipeline_mode = #tpu.pipeline_mode<synchronous>, transform_indices = @transform_1, window_bounds = array<i64: 128, 128>}, {pipeline_mode = #tpu.pipeline_mode<synchronous>, transform_indices = @transform_2, window_bounds = array<i64: 1, 128>}, {pipeline_mode = #tpu.pipeline_mode<synchronous>, transform_indices = @transform_3, window_bounds = array<i64: 1, 128>}, {transform_indices = @transform_4, window_bounds = array<i64: 4, 128>}]} {
    %c0 = arith.constant 0 : index
    %c0_0 = arith.constant 0 : index
    %0 = vector.load %arg1[%c0, %c0_0] : memref<4x128xf32, #tpu.memory_space<vmem>>, vector<4x128xf32>
    %c0_1 = arith.constant 0 : index
    %c0_2 = arith.constant 0 : index
    %1 = vector.load %arg2[%c0_1, %c0_2] : memref<128x128xf32, #tpu.memory_space<vmem>>, vector<128x128xf32>
    %cst = arith.constant dense<0.000000e+00> : vector<4x128xf32>
    %2 = tpu.matmul %0, %1, %cst {dimension_numbers = #tpu.dot_dimension_numbers<[1], [0], [0], [1], [0, 0, 1, 1], [], []>} : vector<4x128xf32>, vector<128x128xf32>, vector<4x128xf32> -> vector<4x128xf32>
    %3 = arith.subf %0, %2 : vector<4x128xf32>
    %4 = arith.mulf %3, %3 : vector<4x128xf32>
    %cst_3 = arith.constant dense<0.000000e+00> : vector<4x128xf32>
    %5 = tpu.matmul %4, %1, %cst_3 {dimension_numbers = #tpu.dot_dimension_numbers<[1], [0], [0], [1], [0, 0, 1, 1], [], []>} : vector<4x128xf32>, vector<128x128xf32>, vector<4x128xf32> -> vector<4x128xf32>
    %cst_4 = arith.constant 9.99999997E-7 : f32
    %6 = vector.broadcast %cst_4 : f32 to vector<4x128xf32>
    %7 = arith.addf %5, %6 : vector<4x128xf32>
    %8 = math.rsqrt %7 : vector<4x128xf32>
    %c0_5 = arith.constant 0 : index
    %c0_6 = arith.constant 0 : index
    %9 = vector.load %arg3[%c0_5, %c0_6] : memref<1x128xf32, #tpu.memory_space<vmem>>, vector<1x128xf32>
    %10 = vector.broadcast %9 : vector<1x128xf32> to vector<4x128xf32>
    %11 = arith.mulf %8, %10 : vector<4x128xf32>
    %12 = arith.mulf %3, %11 : vector<4x128xf32>
    %c0_7 = arith.constant 0 : index
    %c0_8 = arith.constant 0 : index
    %13 = vector.load %arg4[%c0_7, %c0_8] : memref<1x128xf32, #tpu.memory_space<vmem>>, vector<1x128xf32>
    %14 = vector.broadcast %13 : vector<1x128xf32> to vector<4x128xf32>
    %15 = arith.addf %12, %14 : vector<4x128xf32>
    %c0_9 = arith.constant 0 : index
    %c0_10 = arith.constant 0 : index
    %16 = vector.load %arg5[%c0_9, %c0_10] : memref<4x128xf32, #tpu.memory_space<vmem>>, vector<4x128xf32>
    tpu.vector_store %arg5[%c0_9, %c0_10], %15 {strides = array<i32>} : memref<4x128xf32, #tpu.memory_space<vmem>>, vector<4x128xf32>,
    return
  }
  func.func @transform_0(%arg0: i32) -> (i32, i32) {
    %c0_i32 = arith.constant 0 : i32
    %c0_i32_0 = arith.constant 0 : i32
    return %arg0, %c0_i32 : i32, i32
  }
  func.func @transform_1(%arg0: i32) -> (i32, i32) {
    %c0_i32 = arith.constant 0 : i32
    %c0_i32_0 = arith.constant 0 : i32
    %c0_i32_1 = arith.constant 0 : i32
    return %c0_i32, %c0_i32_0 : i32, i32
  }
  func.func @transform_2(%arg0: i32) -> (i32, i32) {
    %c0_i32 = arith.constant 0 : i32
    %c0_i32_0 = arith.constant 0 : i32
    %c0_i32_1 = arith.constant 0 : i32
    return %c0_i32, %c0_i32_0 : i32, i32
  }
  func.func @transform_3(%arg0: i32) -> (i32, i32) {
    %c0_i32 = arith.constant 0 : i32
    %c0_i32_0 = arith.constant 0 : i32
    %c0_i32_1 = arith.constant 0 : i32
    return %c0_i32, %c0_i32_0 : i32, i32
  }
  func.func @transform_4(%arg0: i32) -> (i32, i32) {
    %c0_i32 = arith.constant 0 : i32
    %c0_i32_0 = arith.constant 0 : i32
    return %arg0, %c0_i32 : i32, i32
  }
}

</mosaic_0001>

<bundles_post_ra>
// kernel: layer_normalization.1
= control target key start
LH: loop header
LB: loop body
LE: loop exit
PB: predicated region body
PF: predicated region fallthrough
CT: control target
= control target key end

     0   :  { %v358_v0 = vmov 0.0|0.0   ;;  %vm359_vm0 = vmmov 0   ;;  %v360_v4 = vmov 0.0   ;;  %s446_s1 = inlined_call_operand.vmem [shape: f32[128,128], index: 1, kind: input, shape index: {}]   ;;  %s447_s0 = inlined_call_operand.vmem [shape: f32[4,128], index: 0, kind: input, shape index: {}]   ;;  %s448_s2 = inlined_call_operand.vmem [shape: f32[1,128], index: 2, kind: input, shape index: {}]   ;;  %s449_s3 = inlined_call_operand.vmem [shape: f32[1,128], index: 3, kind: input, shape index: {}]   ;;  %s450_s4 = inlined_call_operand.vmem [shape: f32[4,128], index: 4, kind: output, shape index: {}]  }
   0x1   :  { %305 = vmatprep.subr.bf16.mxu0 %v358_v0  ;;  %v18_v1 = vld [vmem:[%s446_s1] sm:$0xff]  ;;  %v19_v2 = vld [vmem:[%s446_s1 + $0x8] sm:$0xff]  ;;  %v20_v3 = vld [vmem:[%s446_s1 + $0x10] sm:$0xff]  ;;  %267 = vmatprep.mubr.msk.f32.mxu0 %vm359_vm0, %v360_v4 }
   0x2   :  { %v306_v5 = vpack.c.bf16 %v19_v2, %v18_v1  ;;  %v21_v6 = vld [vmem:[%s446_s1 + $0x18] sm:$0xff]  ;;  %329 = vmatprep.subr.bf16.mxu1 %v358_v0  ;;  %302 = vmatprep.mubr.msk.f32.mxu1 %vm359_vm0, %v360_v4  ;;  %v22_v8 = vld [vmem:[%s446_s1 + $0x20] sm:$0xff]  ;;  %v23_v9 = vld [vmem:[%s446_s1 + $0x28] sm:$0xff] }
   0x3   :  { %v309_v7 = vpack.c.bf16 %v21_v6, %v20_v3  ;;  %v312_v10 = vpack.c.bf16 %v23_v9, %v22_v8  ;;  %v24_v11 = vld [vmem:[%s446_s1 + $0x30] sm:$0xff]  ;;  %v25_v12 = vld [vmem:[%s446_s1 + $0x38] sm:$0xff]  ;;  %v26_v14 = vld [vmem:[%s446_s1 + $0x40] sm:$0xff] }
   0x4   :  { %307 = vmatpush3.bf16.msra.mxu0 %v306_v5  ;;  %331 = vmatpush3.bf16.msra.mxu1 %v306_v5  ;;  %v315_v13 = vpack.c.bf16 %v25_v12, %v24_v11  ;;  %v27_v15 = vld [vmem:[%s446_s1 + $0x48] sm:$0xff]  ;;  %v28_v17 = vld [vmem:[%s446_s1 + $0x50] sm:$0xff]  ;;  %v29_v18 = vld [vmem:[%s446_s1 + $0x58] sm:$0xff] }
   0x5   :  { %308 = vmatprep.subr.bf16.mxu0 %v358_v0  ;;  %332 = vmatprep.subr.bf16.mxu1 %v358_v0  ;;  %v318_v16 = vpack.c.bf16 %v27_v15, %v26_v14  ;;  %v321_v19 = vpack.c.bf16 %v29_v18, %v28_v17  ;;  %v30_v20 = vld [vmem:[%s446_s1 + $0x60] sm:$0xff]  ;;  %v31_v21 = vld [vmem:[%s446_s1 + $0x68] sm:$0xff]  ;;  %v32_v23 = vld [vmem:[%s446_s1 + $0x70] sm:$0xff] }
   0x6   :  { %v324_v22 = vpack.c.bf16 %v31_v21, %v30_v20  ;;  %v33_v24 = vld [vmem:[%s446_s1 + $0x78] sm:$0xff]  ;;  %v17_v26 = vld [vmem:[%s447_s0] sm:$0xf] }
   0x7   :  { %v327_v25 = vpack.c.bf16 %v33_v24, %v32_v23  ;;  %v199_v34 = vld [vmem:[%s448_s2] ss:$0 sm:$0xff] }
   0x8   :  { %310 = vmatpush3.bf16.msra.mxu0 %v309_v7  ;;  %334 = vmatpush3.bf16.msra.mxu1 %v309_v7  ;;  %v200_v37 = vld [vmem:[%s449_s3] ss:$0 sm:$0xff] }
   0x9   :  { %311 = vmatprep.subr.bf16.mxu0 %v358_v0  ;;  %335 = vmatprep.subr.bf16.mxu1 %v358_v0 }
   0xc   :  { %313 = vmatpush3.bf16.msra.mxu0 %v312_v10  ;;  %337 = vmatpush3.bf16.msra.mxu1 %v312_v10 }
   0xd   :  { %314 = vmatprep.subr.bf16.mxu0 %v358_v0  ;;  %338 = vmatprep.subr.bf16.mxu1 %v358_v0 }
  0x10   :  { %316 = vmatpush3.bf16.msra.mxu0 %v315_v13  ;;  %340 = vmatpush3.bf16.msra.mxu1 %v315_v13 }
  0x11   :  { %317 = vmatprep.subr.bf16.mxu0 %v358_v0  ;;  %341 = vmatprep.subr.bf16.mxu1 %v358_v0 }
  0x14   :  { %319 = vmatpush3.bf16.msra.mxu0 %v318_v16  ;;  %343 = vmatpush3.bf16.msra.mxu1 %v318_v16 }
  0x15   :  { %320 = vmatprep.subr.bf16.mxu0 %v358_v0  ;;  %344 = vmatprep.subr.bf16.mxu1 %v358_v0 }
  0x18   :  { %322 = vmatpush3.bf16.msra.mxu0 %v321_v19  ;;  %346 = vmatpush3.bf16.msra.mxu1 %v321_v19 }
  0x19   :  { %323 = vmatprep.subr.bf16.mxu0 %v358_v0  ;;  %347 = vmatprep.subr.bf16.mxu1 %v358_v0 }
  0x1c   :  { %325 = vmatpush3.bf16.msra.mxu0 %v324_v22  ;;  %349 = vmatpush3.bf16.msra.mxu1 %v324_v22 }
  0x1d   :  { %326 = vmatprep.subr.bf16.mxu0 %v358_v0  ;;  %350 = vmatprep.subr.bf16.mxu1 %v358_v0 }
  0x20   :  { %328 = vmatpush3.bf16.msra.mxu0 %v327_v25  ;;  %352 = vmatpush3.bf16.msra.mxu1 %v327_v25 }
  0x23   :  { %268 = vmatmul.mubr.f32.vlgmr.msra.gmra.mrb[0].mxu0 %v17_v26 }
  0xf6   :  { %v100_v27 = vpop.f32.mrb[0].mxu0 }
  0xf7   :  { %v104_v28 = vsub.f32 %v17_v26, %v100_v27  ;;  %v269_v29 = vpop.f32.mrb[1].mxu0 }
  0xf9   :  { %v105_v30 = vmul.f32 %v104_v28, %v104_v28 }
  0xfb   :  { %303 = vmatmul.mubr.f32.vlgmr.msra.gmra.mrb[0].mxu1 %v105_v30 }
 0x1ce   :  { %v172_v31 = vpop.f32.mrb[0].mxu1 }
 0x1cf   :  { %v173_v32 = vadd.f32 1e-06, %v172_v31  ;;  %v304_v33 = vpop.f32.mrb[1].mxu1 }
 0x1d1   :  { %356 = vrsqrt.f32 %v173_v32 }
 0x1db   :  { %v357_v35 = vpop.eup %356 }
 0x1dc   :  { %v184_v36 = vmul.f32 %v357_v35, %v199_v34 }
 0x1de   :  { %v185_v38 = vmul.f32 %v184_v36, %v104_v28 }
 0x1e0   :  { %v193_v39 = vadd.f32 %v200_v37, %v185_v38 }
 0x1e2   :  { %194 = vst [vmem:[%s450_s4] sm:$0xf] %v193_v39 }

</bundles_post_ra>
